<compile_context>
chip_gen: v7x
topology: tpu7x:2x2x1
jax: 0.10.0
libtpu: 0.0.40
codegen_flags: <defaults>
</compile_context>

<pallas_src>
import functools

import jax
import jax.numpy as jnp
from jax import lax
from jax.experimental import pallas as pl
from jax.experimental.pallas import tpu as pltpu


def _fill_padded(xpad_ref, x_ref, *, padding, l):
    """Cast the f32 x tile to bf16 and zero-pad it along L, all inside VMEM."""
    if padding > 0:
        xpad_ref[...] = jnp.zeros_like(xpad_ref)
    xpad_ref[:, :, padding:padding + l] = x_ref[...].astype(xpad_ref.dtype)


def _conv_act_one(xpad_ref, w_ref, b, *, c_in, k_size, stride, l_out, activation):
    """Conv1d (no bias) + optional activation for batch element `b` of the block.

    xpad_ref: (B_blk, C_in, L_pad) bf16 scratch (already zero padded).
    w_ref:    (C_out, K*C_in) bf16, columns ordered [tap, c_in].
    Returns (C_out, L_out) float32.
    """
    # For stride > 1 compute the stride-1 conv and subsample once afterwards
    # (avoids K strided lane loads through the XLU).
    l_len = l_out if stride == 1 else stride * (l_out - 1) + 1
    acc = None
    for kk in range(k_size):                         # K is small & static -> unrolled
        wk = w_ref[:, kk * c_in:(kk + 1) * c_in]     # (C_out, C_in)  bf16
        xk = xpad_ref[b, :, kk:kk + l_len]           # (C_in, l_len)  bf16, contiguous
        t = jnp.dot(wk, xk, preferred_element_type=jnp.float32)
        acc = t if acc is None else acc + t
    if stride > 1:
        acc = acc[:, ::stride]                       # single post-matmul lane subsample
    if activation is not None:
        acc = activation(acc)
    return acc                                       # (C_out, L_out) f32


def _stats_kernel(x_ref, w_ref, stat_ref, xpad_ref, *, b_blk, c_in, k_size,
                  stride, l_out, padding, l, activation):
    """Pass 1: per-batch-block, per-channel partial sum and sum of squares."""
    _fill_padded(xpad_ref, x_ref, padding=padding, l=l)
    s = None
    q = None
    for b in range(b_blk):                           # B_blk is small & static
        y = _conv_act_one(xpad_ref, w_ref, b, c_in=c_in, k_size=k_size,
                          stride=stride, l_out=l_out, activation=activation)
        ys = jnp.sum(y, axis=1, keepdims=True)       # (C_out, 1)
        yq = jnp.sum(y * y, axis=1, keepdims=True)   # (C_out, 1)
        s = ys if s is None else s + ys
        q = yq if q is None else q + yq
    # Single merged (C_out, 2) output stream: sum in lane 0, sumsq in lane 1.
    stat_ref[:, 0:1] = s
    stat_ref[:, 1:2] = q


def _normalize_kernel(x_ref, w_ref, ss_ref, o_ref, xpad_ref, *, b_blk, c_in,
                      k_size, stride, l_out, padding, l, activation):
    """Pass 2: recompute conv+act, apply folded BN affine, lane-dense store."""
    _fill_padded(xpad_ref, x_ref, padding=padding, l=l)
    scale = ss_ref[:, 0:1]                           # (C_out, 1) f32
    shift = ss_ref[:, 1:2]                           # (C_out, 1) f32
    for b in range(b_blk):
        y = _conv_act_one(xpad_ref, w_ref, b, c_in=c_in, k_size=k_size,
                          stride=stride, l_out=l_out, activation=activation)
        o_ref[b] = (y * scale + shift).astype(o_ref.dtype)


def batch_norm_conv1d(x, weight, gamma, beta, *, stride=1, padding=0,
                      activation=None, eps=1e-5, out_dtype=jnp.float32,
                      batch_block=8):
    """x: (N, C_in, L) f32 (PyTorch NCL). weight: (C_out, C_in, K).

    Returns (N, C_out, L_out), matching BatchNormConv1d.forward in training mode.
    Set out_dtype=jnp.bfloat16 if downstream consumers accept it (halves the
    dominant HBM write stream of pass 2).
    """
    n, c_in, l = x.shape
    c_out, _, k = weight.shape
    l_pad = l + 2 * padding
    l_out = (l_pad - k) // stride + 1

    # Pick a batch block that divides N (amortizes per-grid-step overhead).
    b_blk = max(1, min(n, batch_block))
    while n % b_blk:
        b_blk -= 1
    n_blk = n // b_blk

    # Weights are tiny: fold to (C_out, K*C_in) bf16 in the wrapper
    # (column index = tap*C_in + ci, matching the in-kernel tap slicing).
    w2 = jnp.transpose(weight, (0, 2, 1)).reshape(c_out, k * c_in).astype(jnp.bfloat16)

    kern_kw = dict(b_blk=b_blk, c_in=c_in, k_size=k, stride=stride,
                   l_out=l_out, padding=padding, l=l, activation=activation)
    cparams = pltpu.CompilerParams(
        dimension_semantics=("parallel",),
        vmem_limit_bytes=64 * 1024 * 1024,
    )

    x_spec = pl.BlockSpec((b_blk, c_in, l), lambda i: (i, 0, 0))
    w_spec = pl.BlockSpec((c_out, k * c_in), lambda i: (0, 0))
    scratch = [pltpu.VMEM((b_blk, c_in, l_pad), jnp.bfloat16)]

    # ---- Pass 1: conv+act, merged per-block partial statistics. --------------
    stats = pl.pallas_call(
        functools.partial(_stats_kernel, **kern_kw),
        out_shape=jax.ShapeDtypeStruct((n_blk, c_out, 2), jnp.float32),
        grid=(n_blk,),
        in_specs=[x_spec, w_spec],
        out_specs=pl.BlockSpec((None, c_out, 2), lambda i: (i, 0, 0)),
        scratch_shapes=scratch,
        compiler_params=cparams,
    )(x, w2)

    # ---- Tiny cross-block reduction + BN affine folding in plain JAX (f32). --
    # NOTE: E[y^2] - mean^2 is less stable than a two-pass variance, but the
    # accumulators are f32 and the activations here are O(1); clamp at 0.
    count = n * l_out
    sums = jnp.sum(stats, axis=0)                                   # (C_out, 2)
    mean = sums[:, 0:1] / count
    var = jnp.maximum(sums[:, 1:2] / count - mean * mean, 0.0)
    inv = lax.rsqrt(var + eps)
    scale = gamma.reshape(c_out, 1).astype(jnp.float32) * inv       # gamma/sqrt(var+eps)
    shift = beta.reshape(c_out, 1).astype(jnp.float32) - mean * scale
    scale_shift = jnp.concatenate([scale, shift], axis=1)           # (C_out, 2)

    # ---- Pass 2: recompute conv+act, apply folded BN; output stays NCL. ------
    out = pl.pallas_call(
        functools.partial(_normalize_kernel, **kern_kw),
        out_shape=jax.ShapeDtypeStruct((n, c_out, l_out), out_dtype),
        grid=(n_blk,),
        in_specs=[x_spec, w_spec, pl.BlockSpec((c_out, 2), lambda i: (0, 0))],
        out_specs=pl.BlockSpec((b_blk, c_out, l_out), lambda i: (i, 0, 0)),
        scratch_shapes=scratch,
        compiler_params=cparams,
    )(x, w2, scale_shift)
    return out


if __name__ == "__main__":
    key = jax.random.PRNGKey(0)
    kx, kw = jax.random.split(key)

    # BatchNormConv1d(in_dim=8, out_dim=16, kernel_size=3, stride=1, padding=1,
    #                 activation=relu, w_init_gain='linear')
    N, C_IN, C_OUT, L, K = 2, 8, 16, 16, 3
    STRIDE, PAD = 1, 1
    L_OUT = (L + 2 * PAD - K) // STRIDE + 1

    x = jax.random.normal(kx, (N, C_IN, L), jnp.float32)

    # xavier_uniform_ with gain = calculate_gain('linear') = 1.0
    fan_in, fan_out = C_IN * K, C_OUT * K
    bound = (6.0 / (fan_in + fan_out)) ** 0.5
    weight = jax.random.uniform(kw, (C_OUT, C_IN, K), jnp.float32, -bound, bound)

    # BatchNorm1d affine params at their PyTorch init values
    gamma = jnp.ones((C_OUT,), jnp.float32)
    beta = jnp.zeros((C_OUT,), jnp.float32)

    @jax.jit
    def run(x_, w_, g_, b_):
        return batch_norm_conv1d(x_, w_, g_, b_, stride=STRIDE, padding=PAD,
                                 activation=jax.nn.relu, eps=1e-5)

    out = jax.block_until_ready(run(x, weight, gamma, beta))
    assert out.shape == (N, C_OUT, L_OUT), out.shape
    assert out.dtype == jnp.float32

    # Pure-JAX f32 reference of the module's training-mode forward (sanity check;
    # tolerance is loose because the kernel's conv runs with bf16 operands).
    xp = jnp.pad(x, ((0, 0), (0, 0), (PAD, PAD)))
    cols = jnp.stack([xp[:, :, t:t + L_OUT] for t in range(K)], axis=-1)  # stride=1
    y = jax.nn.relu(jnp.einsum('nctk,ock->not', cols, weight))
    mu = y.mean(axis=(0, 2), keepdims=True)
    vr = ((y - mu) ** 2).mean(axis=(0, 2), keepdims=True)
    ref = (y - mu) * lax.rsqrt(vr + 1e-5) * gamma[None, :, None] + beta[None, :, None]
    err = float(jnp.max(jnp.abs(out - ref)))
    assert err < 1e-1, f"max abs err {err}"
    print("KERNEL_OK")
</pallas_src>

<mosaic_0001>
module attributes {stable_mosaic.version = 11 : i64} {
  func.func @_stats_kernel(%arg0: i32, %arg1: memref<2x8x16xf32, #tpu.memory_space<vmem>>, %arg2: memref<16x24xbf16, #tpu.memory_space<vmem>>, %arg3: memref<1x16x2xf32, #tpu.memory_space<vmem>>, %arg4: memref<2x8x18xbf16, #tpu.memory_space<vmem>>) attributes {dimension_semantics = [#tpu.dimension_semantics<parallel>], iteration_bounds = array<i64: 1>, scalar_prefetch = 0 : i64, scratch_operands = 1 : i64, tpu.core_type = #tpu.core_type<tc>, window_params = [{transform_indices = @transform_0, window_bounds = array<i64: 2, 8, 16>}, {pipeline_mode = #tpu.pipeline_mode<synchronous>, transform_indices = @transform_1, window_bounds = array<i64: 16, 24>}, {transform_indices = @transform_2, window_bounds = array<i64: 1, 16, 2>}]} {
    %cst = arith.constant 0.000000e+00 : bf16
    %0 = vector.broadcast %cst : bf16 to vector<2x8x18xbf16>
    %c0 = arith.constant 0 : index
    %c0_0 = arith.constant 0 : index
    %c0_1 = arith.constant 0 : index
    %1 = vector.load %arg4[%c0, %c0_0, %c0_1] : memref<2x8x18xbf16, #tpu.memory_space<vmem>>, vector<2x8x18xbf16>
    tpu.vector_store %arg4[%c0, %c0_0, %c0_1], %0 {strides = array<i32>} : memref<2x8x18xbf16, #tpu.memory_space<vmem>>, vector<2x8x18xbf16>,
    %c0_2 = arith.constant 0 : index
    %c0_3 = arith.constant 0 : index
    %c0_4 = arith.constant 0 : index
    %2 = vector.load %arg1[%c0_2, %c0_3, %c0_4] : memref<2x8x16xf32, #tpu.memory_space<vmem>>, vector<2x8x16xf32>
    %3 = arith.truncf %2 : vector<2x8x16xf32> to vector<2x8x16xbf16>
    %c0_5 = arith.constant 0 : index
    %c0_6 = arith.constant 0 : index
    %c1 = arith.constant 1 : index
    %4 = vector.load %arg4[%c0_5, %c0_6, %c1] : memref<2x8x18xbf16, #tpu.memory_space<vmem>>, vector<2x8x16xbf16>
    tpu.vector_store %arg4[%c0_5, %c0_6, %c1], %3 {strides = array<i32>} : memref<2x8x18xbf16, #tpu.memory_space<vmem>>, vector<2x8x16xbf16>,
    %c0_7 = arith.constant 0 : index
    %c0_8 = arith.constant 0 : index
    %5 = vector.load %arg2[%c0_7, %c0_8] : memref<16x24xbf16, #tpu.memory_space<vmem>>, vector<16x8xbf16>
    %c0_9 = arith.constant 0 : index
    %c0_10 = arith.constant 0 : index
    %c0_11 = arith.constant 0 : index
    %6 = vector.load %arg4[%c0_9, %c0_10, %c0_11] : memref<2x8x18xbf16, #tpu.memory_space<vmem>>, vector<1x8x16xbf16>
    %7 = vector.shape_cast %6 : vector<1x8x16xbf16> to vector<8x16xbf16>
    %cst_12 = arith.constant dense<0.000000e+00> : vector<16x16xf32>
    %8 = tpu.matmul %5, %7, %cst_12 {dimension_numbers = #tpu.dot_dimension_numbers<[1], [0], [0], [1], [0, 0, 1, 1], [], []>} : vector<16x8xbf16>, vector<8x16xbf16>, vector<16x16xf32> -> vector<16x16xf32>
    %c0_13 = arith.constant 0 : index
    %c8 = arith.constant 8 : index
    %9 = vector.load %arg2[%c0_13, %c8] : memref<16x24xbf16, #tpu.memory_space<vmem>>, vector<16x8xbf16>
    %c0_14 = arith.constant 0 : index
    %c0_15 = arith.constant 0 : index
    %c1_16 = arith.constant 1 : index
    %10 = vector.load %arg4[%c0_14, %c0_15, %c1_16] : memref<2x8x18xbf16, #tpu.memory_space<vmem>>, vector<1x8x16xbf16>
    %11 = vector.shape_cast %10 : vector<1x8x16xbf16> to vector<8x16xbf16>
    %cst_17 = arith.constant dense<0.000000e+00> : vector<16x16xf32>
    %12 = tpu.matmul %9, %11, %cst_17 {dimension_numbers = #tpu.dot_dimension_numbers<[1], [0], [0], [1], [0, 0, 1, 1], [], []>} : vector<16x8xbf16>, vector<8x16xbf16>, vector<16x16xf32> -> vector<16x16xf32>
    %13 = arith.addf %8, %12 : vector<16x16xf32>
    %c0_18 = arith.constant 0 : index
    %c16 = arith.constant 16 : index
    %14 = vector.load %arg2[%c0_18, %c16] : memref<16x24xbf16, #tpu.memory_space<vmem>>, vector<16x8xbf16>
    %c0_19 = arith.constant 0 : index
    %c0_20 = arith.constant 0 : index
    %c2 = arith.constant 2 : index
    %15 = vector.load %arg4[%c0_19, %c0_20, %c2] : memref<2x8x18xbf16, #tpu.memory_space<vmem>>, vector<1x8x16xbf16>
    %16 = vector.shape_cast %15 : vector<1x8x16xbf16> to vector<8x16xbf16>
    %cst_21 = arith.constant dense<0.000000e+00> : vector<16x16xf32>
    %17 = tpu.matmul %14, %16, %cst_21 {dimension_numbers = #tpu.dot_dimension_numbers<[1], [0], [0], [1], [0, 0, 1, 1], [], []>} : vector<16x8xbf16>, vector<8x16xbf16>, vector<16x16xf32> -> vector<16x16xf32>
    %18 = arith.addf %13, %17 : vector<16x16xf32>
    %cst_22 = arith.constant 0.000000e+00 : f32
    %19 = vector.broadcast %cst_22 : f32 to vector<16x16xf32>
    %20 = arith.maximumf %18, %19 : vector<16x16xf32>
    %cst_23 = arith.constant dense<0.000000e+00> : vector<16xf32>
    %21 = vector.multi_reduction <add>, %20, %cst_23 [1] : vector<16x16xf32> to vector<16xf32>
    %22 = vector.shape_cast %21 : vector<16xf32> to vector<16x1xf32>
    %23 = arith.mulf %20, %20 : vector<16x16xf32>
    %cst_24 = arith.constant dense<0.000000e+00> : vector<16xf32>
    %24 = vector.multi_reduction <add>, %23, %cst_24 [1] : vector<16x16xf32> to vector<16xf32>
    %25 = vector.shape_cast %24 : vector<16xf32> to vector<16x1xf32>
    %c0_25 = arith.constant 0 : index
    %c0_26 = arith.constant 0 : index
    %26 = vector.load %arg2[%c0_25, %c0_26] : memref<16x24xbf16, #tpu.memory_space<vmem>>, vector<16x8xbf16>
    %c1_27 = arith.constant 1 : index
    %c0_28 = arith.constant 0 : index
    %c0_29 = arith.constant 0 : index
    %27 = vector.load %arg4[%c1_27, %c0_28, %c0_29] : memref<2x8x18xbf16, #tpu.memory_space<vmem>>, vector<1x8x16xbf16>
    %28 = vector.shape_cast %27 : vector<1x8x16xbf16> to vector<8x16xbf16>
    %cst_30 = arith.constant dense<0.000000e+00> : vector<16x16xf32>
    %29 = tpu.matmul %26, %28, %cst_30 {dimension_numbers = #tpu.dot_dimension_numbers<[1], [0], [0], [1], [0, 0, 1, 1], [], []>} : vector<16x8xbf16>, vector<8x16xbf16>, vector<16x16xf32> -> vector<16x16xf32>
    %c0_31 = arith.constant 0 : index
    %c8_32 = arith.constant 8 : index
    %30 = vector.load %arg2[%c0_31, %c8_32] : memref<16x24xbf16, #tpu.memory_space<vmem>>, vector<16x8xbf16>
    %c1_33 = arith.constant 1 : index
    %c0_34 = arith.constant 0 : index
    %c1_35 = arith.constant 1 : index
    %31 = vector.load %arg4[%c1_33, %c0_34, %c1_35] : memref<2x8x18xbf16, #tpu.memory_space<vmem>>, vector<1x8x16xbf16>
    %32 = vector.shape_cast %31 : vector<1x8x16xbf16> to vector<8x16xbf16>
    %cst_36 = arith.constant dense<0.000000e+00> : vector<16x16xf32>
    %33 = tpu.matmul %30, %32, %cst_36 {dimension_numbers = #tpu.dot_dimension_numbers<[1], [0], [0], [1], [0, 0, 1, 1], [], []>} : vector<16x8xbf16>, vector<8x16xbf16>, vector<16x16xf32> -> vector<16x16xf32>
    %34 = arith.addf %29, %33 : vector<16x16xf32>
    %c0_37 = arith.constant 0 : index
    %c16_38 = arith.constant 16 : index
    %35 = vector.load %arg2[%c0_37, %c16_38] : memref<16x24xbf16, #tpu.memory_space<vmem>>, vector<16x8xbf16>
    %c1_39 = arith.constant 1 : index
    %c0_40 = arith.constant 0 : index
    %c2_41 = arith.constant 2 : index
    %36 = vector.load %arg4[%c1_39, %c0_40, %c2_41] : memref<2x8x18xbf16, #tpu.memory_space<vmem>>, vector<1x8x16xbf16>
    %37 = vector.shape_cast %36 : vector<1x8x16xbf16> to vector<8x16xbf16>
    %cst_42 = arith.constant dense<0.000000e+00> : vector<16x16xf32>
    %38 = tpu.matmul %35, %37, %cst_42 {dimension_numbers = #tpu.dot_dimension_numbers<[1], [0], [0], [1], [0, 0, 1, 1], [], []>} : vector<16x8xbf16>, vector<8x16xbf16>, vector<16x16xf32> -> vector<16x16xf32>
    %39 = arith.addf %34, %38 : vector<16x16xf32>
    %cst_43 = arith.constant 0.000000e+00 : f32
    %40 = vector.broadcast %cst_43 : f32 to vector<16x16xf32>
    %41 = arith.maximumf %39, %40 : vector<16x16xf32>
    %cst_44 = arith.constant dense<0.000000e+00> : vector<16xf32>
    %42 = vector.multi_reduction <add>, %41, %cst_44 [1] : vector<16x16xf32> to vector<16xf32>
    %43 = vector.shape_cast %42 : vector<16xf32> to vector<16x1xf32>
    %44 = arith.mulf %41, %41 : vector<16x16xf32>
    %cst_45 = arith.constant dense<0.000000e+00> : vector<16xf32>
    %45 = vector.multi_reduction <add>, %44, %cst_45 [1] : vector<16x16xf32> to vector<16xf32>
    %46 = vector.shape_cast %45 : vector<16xf32> to vector<16x1xf32>
    %47 = arith.addf %22, %43 : vector<16x1xf32>
    %48 = arith.addf %25, %46 : vector<16x1xf32>
    %c0_46 = arith.constant 0 : index
    %c0_47 = arith.constant 0 : index
    %c0_48 = arith.constant 0 : index
    %49 = vector.load %arg3[%c0_46, %c0_47, %c0_48] : memref<1x16x2xf32, #tpu.memory_space<vmem>>, vector<1x16x1xf32>
    %50 = vector.shape_cast %49 : vector<1x16x1xf32> to vector<16x1xf32>
    %51 = vector.shape_cast %47 : vector<16x1xf32> to vector<1x16x1xf32>
    tpu.vector_store %arg3[%c0_46, %c0_47, %c0_48], %51 {strides = array<i32>} : memref<1x16x2xf32, #tpu.memory_space<vmem>>, vector<1x16x1xf32>,
    %c0_49 = arith.constant 0 : index
    %c0_50 = arith.constant 0 : index
    %c1_51 = arith.constant 1 : index
    %52 = vector.load %arg3[%c0_49, %c0_50, %c1_51] : memref<1x16x2xf32, #tpu.memory_space<vmem>>, vector<1x16x1xf32>
    %53 = vector.shape_cast %52 : vector<1x16x1xf32> to vector<16x1xf32>
    %54 = vector.shape_cast %48 : vector<16x1xf32> to vector<1x16x1xf32>
    tpu.vector_store %arg3[%c0_49, %c0_50, %c1_51], %54 {strides = array<i32>} : memref<1x16x2xf32, #tpu.memory_space<vmem>>, vector<1x16x1xf32>,
    return
  }
  func.func @transform_0(%arg0: i32) -> (i32, i32, i32) {
    %c0_i32 = arith.constant 0 : i32
    %c0_i32_0 = arith.constant 0 : i32
    %c0_i32_1 = arith.constant 0 : i32
    return %arg0, %c0_i32, %c0_i32_0 : i32, i32, i32
  }
  func.func @transform_1(%arg0: i32) -> (i32, i32) {
    %c0_i32 = arith.constant 0 : i32
    %c0_i32_0 = arith.constant 0 : i32
    %c0_i32_1 = arith.constant 0 : i32
    return %c0_i32, %c0_i32_0 : i32, i32
  }
  func.func @transform_2(%arg0: i32) -> (i32, i32, i32) {
    %c0_i32 = arith.constant 0 : i32
    %c0_i32_0 = arith.constant 0 : i32
    %c0_i32_1 = arith.constant 0 : i32
    return %arg0, %c0_i32, %c0_i32_0 : i32, i32, i32
  }
}

module attributes {stable_mosaic.version = 11 : i64} {
  func.func @_normalize_kernel(%arg0: i32, %arg1: memref<2x8x16xf32, #tpu.memory_space<vmem>>, %arg2: memref<16x24xbf16, #tpu.memory_space<vmem>>, %arg3: memref<16x2xf32, #tpu.memory_space<vmem>>, %arg4: memref<2x16x16xf32, #tpu.memory_space<vmem>>, %arg5: memref<2x8x18xbf16, #tpu.memory_space<vmem>>) attributes {dimension_semantics = [#tpu.dimension_semantics<parallel>], iteration_bounds = array<i64: 1>, scalar_prefetch = 0 : i64, scratch_operands = 1 : i64, tpu.core_type = #tpu.core_type<tc>, window_params = [{transform_indices = @transform_0, window_bounds = array<i64: 2, 8, 16>}, {pipeline_mode = #tpu.pipeline_mode<synchronous>, transform_indices = @transform_1, window_bounds = array<i64: 16, 24>}, {pipeline_mode = #tpu.pipeline_mode<synchronous>, transform_indices = @transform_2, window_bounds = array<i64: 16, 2>}, {transform_indices = @transform_3, window_bounds = array<i64: 2, 16, 16>}]} {
    %cst = arith.constant 0.000000e+00 : bf16
    %0 = vector.broadcast %cst : bf16 to vector<2x8x18xbf16>
    %c0 = arith.constant 0 : index
    %c0_0 = arith.constant 0 : index
    %c0_1 = arith.constant 0 : index
    %1 = vector.load %arg5[%c0, %c0_0, %c0_1] : memref<2x8x18xbf16, #tpu.memory_space<vmem>>, vector<2x8x18xbf16>
    tpu.vector_store %arg5[%c0, %c0_0, %c0_1], %0 {strides = array<i32>} : memref<2x8x18xbf16, #tpu.memory_space<vmem>>, vector<2x8x18xbf16>,
    %c0_2 = arith.constant 0 : index
    %c0_3 = arith.constant 0 : index
    %c0_4 = arith.constant 0 : index
    %2 = vector.load %arg1[%c0_2, %c0_3, %c0_4] : memref<2x8x16xf32, #tpu.memory_space<vmem>>, vector<2x8x16xf32>
    %3 = arith.truncf %2 : vector<2x8x16xf32> to vector<2x8x16xbf16>
    %c0_5 = arith.constant 0 : index
    %c0_6 = arith.constant 0 : index
    %c1 = arith.constant 1 : index
    %4 = vector.load %arg5[%c0_5, %c0_6, %c1] : memref<2x8x18xbf16, #tpu.memory_space<vmem>>, vector<2x8x16xbf16>
    tpu.vector_store %arg5[%c0_5, %c0_6, %c1], %3 {strides = array<i32>} : memref<2x8x18xbf16, #tpu.memory_space<vmem>>, vector<2x8x16xbf16>,
    %c0_7 = arith.constant 0 : index
    %c0_8 = arith.constant 0 : index
    %5 = vector.load %arg3[%c0_7, %c0_8] : memref<16x2xf32, #tpu.memory_space<vmem>>, vector<16x1xf32>
    %c0_9 = arith.constant 0 : index
    %c1_10 = arith.constant 1 : index
    %6 = vector.load %arg3[%c0_9, %c1_10] : memref<16x2xf32, #tpu.memory_space<vmem>>, vector<16x1xf32>
    %c0_11 = arith.constant 0 : index
    %c0_12 = arith.constant 0 : index
    %7 = vector.load %arg2[%c0_11, %c0_12] : memref<16x24xbf16, #tpu.memory_space<vmem>>, vector<16x8xbf16>
    %c0_13 = arith.constant 0 : index
    %c0_14 = arith.constant 0 : index
    %c0_15 = arith.constant 0 : index
    %8 = vector.load %arg5[%c0_13, %c0_14, %c0_15] : memref<2x8x18xbf16, #tpu.memory_space<vmem>>, vector<1x8x16xbf16>
    %9 = vector.shape_cast %8 : vector<1x8x16xbf16> to vector<8x16xbf16>
    %cst_16 = arith.constant dense<0.000000e+00> : vector<16x16xf32>
    %10 = tpu.matmul %7, %9, %cst_16 {dimension_numbers = #tpu.dot_dimension_numbers<[1], [0], [0], [1], [0, 0, 1, 1], [], []>} : vector<16x8xbf16>, vector<8x16xbf16>, vector<16x16xf32> -> vector<16x16xf32>
    %c0_17 = arith.constant 0 : index
    %c8 = arith.constant 8 : index
    %11 = vector.load %arg2[%c0_17, %c8] : memref<16x24xbf16, #tpu.memory_space<vmem>>, vector<16x8xbf16>
    %c0_18 = arith.constant 0 : index
    %c0_19 = arith.constant 0 : index
    %c1_20 = arith.constant 1 : index
    %12 = vector.load %arg5[%c0_18, %c0_19, %c1_20] : memref<2x8x18xbf16, #tpu.memory_space<vmem>>, vector<1x8x16xbf16>
    %13 = vector.shape_cast %12 : vector<1x8x16xbf16> to vector<8x16xbf16>
    %cst_21 = arith.constant dense<0.000000e+00> : vector<16x16xf32>
    %14 = tpu.matmul %11, %13, %cst_21 {dimension_numbers = #tpu.dot_dimension_numbers<[1], [0], [0], [1], [0, 0, 1, 1], [], []>} : vector<16x8xbf16>, vector<8x16xbf16>, vector<16x16xf32> -> vector<16x16xf32>
    %15 = arith.addf %10, %14 : vector<16x16xf32>
    %c0_22 = arith.constant 0 : index
    %c16 = arith.constant 16 : index
    %16 = vector.load %arg2[%c0_22, %c16] : memref<16x24xbf16, #tpu.memory_space<vmem>>, vector<16x8xbf16>
    %c0_23 = arith.constant 0 : index
    %c0_24 = arith.constant 0 : index
    %c2 = arith.constant 2 : index
    %17 = vector.load %arg5[%c0_23, %c0_24, %c2] : memref<2x8x18xbf16, #tpu.memory_space<vmem>>, vector<1x8x16xbf16>
    %18 = vector.shape_cast %17 : vector<1x8x16xbf16> to vector<8x16xbf16>
    %cst_25 = arith.constant dense<0.000000e+00> : vector<16x16xf32>
    %19 = tpu.matmul %16, %18, %cst_25 {dimension_numbers = #tpu.dot_dimension_numbers<[1], [0], [0], [1], [0, 0, 1, 1], [], []>} : vector<16x8xbf16>, vector<8x16xbf16>, vector<16x16xf32> -> vector<16x16xf32>
    %20 = arith.addf %15, %19 : vector<16x16xf32>
    %cst_26 = arith.constant 0.000000e+00 : f32
    %21 = vector.broadcast %cst_26 : f32 to vector<16x16xf32>
    %22 = arith.maximumf %20, %21 : vector<16x16xf32>
    %23 = vector.broadcast %5 : vector<16x1xf32> to vector<16x16xf32>
    %24 = arith.mulf %22, %23 : vector<16x16xf32>
    %25 = vector.broadcast %6 : vector<16x1xf32> to vector<16x16xf32>
    %26 = arith.addf %24, %25 : vector<16x16xf32>
    %c0_27 = arith.constant 0 : index
    %c0_28 = arith.constant 0 : index
    %c0_29 = arith.constant 0 : index
    %27 = vector.load %arg4[%c0_27, %c0_28, %c0_29] : memref<2x16x16xf32, #tpu.memory_space<vmem>>, vector<1x16x16xf32>
    %28 = vector.shape_cast %27 : vector<1x16x16xf32> to vector<16x16xf32>
    %29 = vector.shape_cast %26 : vector<16x16xf32> to vector<1x16x16xf32>
    tpu.vector_store %arg4[%c0_27, %c0_28, %c0_29], %29 {strides = array<i32>} : memref<2x16x16xf32, #tpu.memory_space<vmem>>, vector<1x16x16xf32>,
    %c0_30 = arith.constant 0 : index
    %c0_31 = arith.constant 0 : index
    %30 = vector.load %arg2[%c0_30, %c0_31] : memref<16x24xbf16, #tpu.memory_space<vmem>>, vector<16x8xbf16>
    %c1_32 = arith.constant 1 : index
    %c0_33 = arith.constant 0 : index
    %c0_34 = arith.constant 0 : index
    %31 = vector.load %arg5[%c1_32, %c0_33, %c0_34] : memref<2x8x18xbf16, #tpu.memory_space<vmem>>, vector<1x8x16xbf16>
    %32 = vector.shape_cast %31 : vector<1x8x16xbf16> to vector<8x16xbf16>
    %cst_35 = arith.constant dense<0.000000e+00> : vector<16x16xf32>
    %33 = tpu.matmul %30, %32, %cst_35 {dimension_numbers = #tpu.dot_dimension_numbers<[1], [0], [0], [1], [0, 0, 1, 1], [], []>} : vector<16x8xbf16>, vector<8x16xbf16>, vector<16x16xf32> -> vector<16x16xf32>
    %c0_36 = arith.constant 0 : index
    %c8_37 = arith.constant 8 : index
    %34 = vector.load %arg2[%c0_36, %c8_37] : memref<16x24xbf16, #tpu.memory_space<vmem>>, vector<16x8xbf16>
    %c1_38 = arith.constant 1 : index
    %c0_39 = arith.constant 0 : index
    %c1_40 = arith.constant 1 : index
    %35 = vector.load %arg5[%c1_38, %c0_39, %c1_40] : memref<2x8x18xbf16, #tpu.memory_space<vmem>>, vector<1x8x16xbf16>
    %36 = vector.shape_cast %35 : vector<1x8x16xbf16> to vector<8x16xbf16>
    %cst_41 = arith.constant dense<0.000000e+00> : vector<16x16xf32>
    %37 = tpu.matmul %34, %36, %cst_41 {dimension_numbers = #tpu.dot_dimension_numbers<[1], [0], [0], [1], [0, 0, 1, 1], [], []>} : vector<16x8xbf16>, vector<8x16xbf16>, vector<16x16xf32> -> vector<16x16xf32>
    %38 = arith.addf %33, %37 : vector<16x16xf32>
    %c0_42 = arith.constant 0 : index
    %c16_43 = arith.constant 16 : index
    %39 = vector.load %arg2[%c0_42, %c16_43] : memref<16x24xbf16, #tpu.memory_space<vmem>>, vector<16x8xbf16>
    %c1_44 = arith.constant 1 : index
    %c0_45 = arith.constant 0 : index
    %c2_46 = arith.constant 2 : index
    %40 = vector.load %arg5[%c1_44, %c0_45, %c2_46] : memref<2x8x18xbf16, #tpu.memory_space<vmem>>, vector<1x8x16xbf16>
    %41 = vector.shape_cast %40 : vector<1x8x16xbf16> to vector<8x16xbf16>
    %cst_47 = arith.constant dense<0.000000e+00> : vector<16x16xf32>
    %42 = tpu.matmul %39, %41, %cst_47 {dimension_numbers = #tpu.dot_dimension_numbers<[1], [0], [0], [1], [0, 0, 1, 1], [], []>} : vector<16x8xbf16>, vector<8x16xbf16>, vector<16x16xf32> -> vector<16x16xf32>
    %43 = arith.addf %38, %42 : vector<16x16xf32>
    %cst_48 = arith.constant 0.000000e+00 : f32
    %44 = vector.broadcast %cst_48 : f32 to vector<16x16xf32>
    %45 = arith.maximumf %43, %44 : vector<16x16xf32>
    %46 = vector.broadcast %5 : vector<16x1xf32> to vector<16x16xf32>
    %47 = arith.mulf %45, %46 : vector<16x16xf32>
    %48 = vector.broadcast %6 : vector<16x1xf32> to vector<16x16xf32>
    %49 = arith.addf %47, %48 : vector<16x16xf32>
    %c1_49 = arith.constant 1 : index
    %c0_50 = arith.constant 0 : index
    %c0_51 = arith.constant 0 : index
    %50 = vector.load %arg4[%c1_49, %c0_50, %c0_51] : memref<2x16x16xf32, #tpu.memory_space<vmem>>, vector<1x16x16xf32>
    %51 = vector.shape_cast %50 : vector<1x16x16xf32> to vector<16x16xf32>
    %52 = vector.shape_cast %49 : vector<16x16xf32> to vector<1x16x16xf32>
    tpu.vector_store %arg4[%c1_49, %c0_50, %c0_51], %52 {strides = array<i32>} : memref<2x16x16xf32, #tpu.memory_space<vmem>>, vector<1x16x16xf32>,
    return
  }
  func.func @transform_0(%arg0: i32) -> (i32, i32, i32) {
    %c0_i32 = arith.constant 0 : i32
    %c0_i32_0 = arith.constant 0 : i32
    %c0_i32_1 = arith.constant 0 : i32
    return %arg0, %c0_i32, %c0_i32_0 : i32, i32, i32
  }
  func.func @transform_1(%arg0: i32) -> (i32, i32) {
    %c0_i32 = arith.constant 0 : i32
    %c0_i32_0 = arith.constant 0 : i32
    %c0_i32_1 = arith.constant 0 : i32
    return %c0_i32, %c0_i32_0 : i32, i32
  }
  func.func @transform_2(%arg0: i32) -> (i32, i32) {
    %c0_i32 = arith.constant 0 : i32
    %c0_i32_0 = arith.constant 0 : i32
    %c0_i32_1 = arith.constant 0 : i32
    return %c0_i32, %c0_i32_0 : i32, i32
  }
  func.func @transform_3(%arg0: i32) -> (i32, i32, i32) {
    %c0_i32 = arith.constant 0 : i32
    %c0_i32_0 = arith.constant 0 : i32
    %c0_i32_1 = arith.constant 0 : i32
    return %arg0, %c0_i32, %c0_i32_0 : i32, i32, i32
  }
}

</mosaic_0001>

<bundles_post_ra>
// kernel: run.2
= control target key start
LH: loop header
LB: loop body
LE: loop exit
PB: predicated region body
PF: predicated region fallthrough
CT: control target
= control target key end

     0   :  { %7 = vsyncpa [#allocation4], 0  ;;  %s696_s0 = inlined_call_operand.hbm [shape: f32[2,8,16], index: 0, kind: input, shape index: {}]   ;;  %s697_s1 = inlined_call_operand.hbm [shape: bf16[16,24], index: 1, kind: input, shape index: {}]   ;;  %s698_s2 = inlined_call_operand.hbm [shape: f32[1,16,2], index: 2, kind: output, shape index: {}]  }
   0x1   :  { %8 = vsyncpa [#allocation7], 0 }
   0x2   :  { %9 = vsyncpa [#allocation5], 0  ;;  %s598_s9 = smov [#allocation3]   ;;  %s526_s13 = scalar_lea.hbm %s696_s0, 256 }
   0x3   :  { %s15_s10 = sshll.u32 %s598_s9, 4  ;;  %p527_p0 = scmp.ne.s32.totalorder %s696_s0, %s526_s13  ;;  %s16_s10 = int_to_ptr.vmem [resolvable:$true] %s15_s10 }
   0x4   :  { %p530_p1 = scmp.lt.u32.totalorder %s526_s13, %s696_s0 }
   0x6   :  { %p532_p2 = pnand %p530_p1, %p527_p0 }
   0x8   :  { %535 = shalt.err (!%p532_p2)
}
   0x9   :  { %s536_s18 = scalar_lea.vmem %s16_s10, 256  ;;  %p541_p4 = scmp.lt.s32.totalorder %s16_s10, %s16_s10 }
   0xa   :  { %p537_p3 = scmp.ne.s32.totalorder %s16_s10, %s536_s18  ;;  %p542_p5 = scmp.lt.s32.totalorder %s536_s18, %s536_s18 }
   0xc   :  { %p543_p6 = por %p542_p5, %p541_p4 }
   0xe   :  { %p544_p7 = pnand %p543_p6, %p537_p3 }
  0x10   :  { %547 = shalt.err (!%p544_p7)
}
  0x11   :  { %s599_s19 = smov 128   ;;  %s600_s20 = smov 8  }
  0x12   :  { %21 = dma.hbm_to_vmem [thread:$0]  %s696_s0, 256, %s16_s10, [#allocation4], %s599_s19, %s599_s19, %s600_s20  }
  0x13   :  { %s601_s23 = smov [#allocation6]   ;;  %s548_s27 = scalar_lea.hbm %s697_s1, 128 }
  0x14   :  { %s27_s24 = sshll.u32 %s601_s23, 4  ;;  %p549_p8 = scmp.ne.s32.totalorder %s697_s1, %s548_s27  ;;  %s28_s24 = int_to_ptr.vmem [resolvable:$true] %s27_s24 }
  0x15   :  { %p552_p9 = scmp.lt.u32.totalorder %s548_s27, %s697_s1 }
  0x17   :  { %p554_p10 = pnand %p552_p9, %p549_p8 }
  0x19   :  { %557 = shalt.err (!%p554_p10)
}
  0x1a   :  { %s558_s4 = scalar_lea.vmem %s28_s24, 128  ;;  %p563_p12 = scmp.lt.s32.totalorder %s28_s24, %s28_s24 }
  0x1b   :  { %p559_p11 = scmp.ne.s32.totalorder %s28_s24, %s558_s4  ;;  %p564_p13 = scmp.lt.s32.totalorder %s558_s4, %s558_s4 }
  0x1d   :  { %p565_p0 = por %p564_p13, %p563_p12 }
  0x1f   :  { %p566_p1 = pnand %p565_p0, %p559_p11 }
  0x21   :  { %569 = shalt.err (!%p566_p1)
}
  0x22   :  { %s602_s0 = smov 64   ;;  %s603_s5 = smov 4  }
  0x23   :  { %33 = dma.hbm_to_vmem [thread:$0]  %s697_s1, 128, %s28_s24, [#allocation7], %s602_s0, %s602_s0, %s603_s5  }
  0x24   :  { %592 = dma.done.wait [#allocation4], 256  }
  0x25   :  { %593 = vsyncadd [#allocation4], 4294967040 }
  0x26   :  { %594 = dma.done.wait [#allocation7], 128  }
  0x27   :  { %595 = vsyncadd [#allocation7], 4294967168  ;;  %vm41_vm0 = vcmask 142336   ;;  %v604_v0 = vmov 0   ;;  %v44_v1 = vld [vmem:[#allocation3] sm:$0xff]  ;;  %v45_v2 = vld [vmem:[#allocation3 + $0x8] sm:$0xff] }
  0x28   :  { %42 = vst.msk [vmem:[#allocation2] sm:$0xf] %vm41_vm0, %v604_v0  ;;  %43 = vst.msk [vmem:[#allocation2 + $0x4] sm:$0xf] %vm41_vm0, %v604_v0  ;;  %v442_v3 = vpack.c.bf16 %v44_v1, %v44_v1  ;;  %s605_s8 = smov 1   ;;  %v443_v4 = vpack.c.bf16 %v45_v2, %v45_v2  ;;  %v523_v5 = vld [vmem:[#allocation6] sm:$0xff]  }
  0x29   :  { %s606_s9 = smov 120   ;;  %vm60_vm1 = vcmask 134152   ;;  %v607_v6 = vmov 0.0   ;;  %vm608_vm2 = vmmov 0   ;;  %s609_s1 = smov 127   ;;  %vm82_vm3 = vcmask 1043456  }
  0x2a   :  { %54 = vrot.lane.b32.xlu0 %v442_v3, %s605_s8  ;;  %456 = vmatprep.subr.bf16.mxu0 %v607_v6  ;;  %s610_s10 = smov 126   ;;  %s611_s11 = smov 112   ;;  %vm78_vm4 = vcmask 64512   ;;  %vm229_vm5 = vcmask 130048   ;;  %vm407_vm6 = vcmask 7168   ;;  %vm410_vm7 = vcmask 15368  }
  0x2b   :  { %474 = vmatprep.subr.bf16.mxu1 %v607_v6  ;;  %458 = vmatprep.mubr.msk.bf16.mxu0 %vm608_vm2, %v607_v6  ;;  %s612_s12 = smov [#allocation8]  }
  0x2c   :  { %476 = vmatprep.mubr.msk.bf16.mxu1 %vm608_vm2, %v607_v6  ;;  %s418_s13 = sshll.u32 %s612_s12, 4  ;;  %s419_s13 = int_to_ptr.vmem [resolvable:$true] %s418_s13 }
  0x2d   :  { %s570_s14 = scalar_lea.vmem %s419_s13, 256  ;;  %p575_p3 = scmp.lt.s32.totalorder %s419_s13, %s419_s13 }
  0x2e   :  { %56 = vrot.lane.b32.xlu0 %v443_v4, %s605_s8  ;;  %p571_p2 = scmp.ne.s32.totalorder %s419_s13, %s570_s14  ;;  %p576_p4 = scmp.lt.s32.totalorder %s570_s14, %s570_s14 }
  0x30   :  { %p577_p5 = por %p576_p4, %p575_p3 }
  0x32   :  { %71 = vrot.lane.b32.xlu0 %v523_v5, %s606_s9  ;;  %p578_p6 = pnand %p577_p5, %p571_p2 }
  0x9c   :  { %v55_v7 = vpop.permute.xlu0 %54 }
  0x9d   :  { %61 = vst.msk [vmem:[#allocation2] sm:$0xf] %vm60_vm1, %v55_v7 }
  0xa0   :  { %v57_v8 = vpop.permute.xlu0 %56 }
  0xa1   :  { %62 = vst.msk [vmem:[#allocation2 + $0x4] sm:$0xf] %vm60_vm1, %v57_v8 }
  0xa4   :  { %v65_v9 = vld [vmem:[#allocation2] sm:$0xf]  ;;  %v72_v15 = vpop.permute.xlu0 %71 }
  0xa5   :  { %v434_v10 = vcombine.low %v65_v9, %v65_v9  ;;  %v131_v17 = vsel %vm82_vm3, %v65_v9, 0 }
  0xa7   :  { %76 = vrot.lane.b32.xlu1 %v434_v10, %s609_s1 }
  0xa8   :  { %v245_v11 = vld [vmem:[#allocation2 + $0x4] sm:$0xf] }
  0xa9   :  { %v438_v12 = vcombine.low %v245_v11, %v245_v11  ;;  %v296_v19 = vsel %vm82_vm3, %v245_v11, 0 }
  0xab   :  { %339 = vrot.lane.b32.xlu0 %v438_v12, %s610_s10  ;;  %249 = vrot.lane.b32.xlu1 %v438_v12, %s609_s1 }
  0xaf   :  { %176 = vrot.lane.b32.xlu1 %v434_v10, %s610_s10 }
  0xb3   :  { %174 = vrot.lane.b32.xlu1 %v523_v5, %s611_s11 }
 0x119   :  { %v77_v13 = vpop.permute.xlu1 %76 }
 0x11a   :  { %v84_v14 = vsel %vm82_vm3, %v77_v13, 0 }
 0x11b   :  { %457 = vmatpush3.bf16.msra.mxu0 %v84_v14 }
 0x11c   :  { %462 = vmatprep.subr.bf16.mxu0 %v607_v6 }
 0x11d   :  { %v250_v16 = vpop.permute.xlu1 %249  ;;  %v340_v22 = vpop.permute.xlu0 %339 }
 0x11e   :  { %459 = vmatmul.mubr.msk.bf16.vlgmr.msra.gmra.mrb[0].mxu0 %vm78_vm4, %v72_v15  ;;  %v252_v18 = vsel %vm82_vm3, %v250_v16, 0  ;;  %v342_v23 = vsel %vm82_vm3, %v340_v22, 0 }
 0x11f   :  { %463 = vmatpush3.bf16.msra.mxu0 %v131_v17  ;;  %475 = vmatpush3.bf16.msra.mxu1 %v252_v18 }
 0x120   :  { %480 = vmatprep.subr.bf16.mxu1 %v607_v6  ;;  %464 = vmatprep.mubr.msk.bf16.mxu0 %vm608_vm2, %v607_v6 }
 0x121   :  { %468 = vmatprep.subr.bf16.mxu0 %v607_v6  ;;  %v177_v20 = vpop.permute.xlu1 %176 }
 0x122   :  { %477 = vmatmul.mubr.msk.bf16.vlgmr.msra.gmra.mrb[0].mxu1 %vm78_vm4, %v72_v15  ;;  %v182_v21 = vsel %vm82_vm3, %v177_v20, 0 }
 0x123   :  { %481 = vmatpush3.bf16.msra.mxu1 %v296_v19  ;;  %482 = vmatprep.mubr.msk.bf16.mxu1 %vm608_vm2, %v607_v6 }
 0x124   :  { %486 = vmatprep.subr.bf16.mxu1 %v607_v6 }
 0x125   :  { %v175_v24 = vpop.permute.xlu1 %174 }
 0x12a   :  { %465 = vmatmul.mubr.msk.bf16.vlgmr.msra.gmra.mrb[0].mxu0 %vm78_vm4, %v523_v5 }
 0x12b   :  { %469 = vmatpush3.bf16.msra.mxu0 %v182_v21  ;;  %470 = vmatprep.mubr.msk.bf16.mxu0 %vm608_vm2, %v607_v6 }
 0x12e   :  { %483 = vmatmul.mubr.msk.bf16.vlgmr.msra.gmra.mrb[0].mxu1 %vm78_vm4, %v523_v5 }
 0x12f   :  { %487 = vmatpush3.bf16.msra.mxu1 %v342_v23  ;;  %488 = vmatprep.mubr.msk.bf16.mxu1 %vm608_vm2, %v607_v6 }
 0x136   :  { %471 = vmatmul.mubr.msk.bf16.vlgmr.msra.gmra.mrb[0].mxu0 %vm78_vm4, %v175_v24 }
 0x13a   :  { %489 = vmatmul.mubr.msk.bf16.vlgmr.msra.gmra.mrb[0].mxu1 %vm78_vm4, %v175_v24 }
 0x209   :  { %v218_v25 = vpop.f32.mrb[0].mxu0 }
 0x20a   :  { %v227_v26 = vmax.f32 %v218_v25, 0.0  ;;  %v472_v27 = vpop.f32.mrb[1].mxu0 }
 0x20b   :  { %v221_v28 = vpop.f32.mrb[2].mxu0 }
 0x20c   :  { %v228_v29 = vmax.f32 %v221_v28, 0.0  ;;  %v473_v30 = vpop.f32.mrb[3].mxu0  ;;  %v230_v31 = vsel %vm229_vm5, %v227_v26, 0.0  ;;  %v236_v36 = vmul.f32 %v227_v26, %v227_v26 }
 0x20d   :  { %v378_v32 = vpop.f32.mrb[0].mxu1  ;;  %231 = vadd.xlane.f32.xlu0 %v230_v31 }
 0x20e   :  { %v387_v33 = vmax.f32 %v378_v32, 0.0  ;;  %v490_v34 = vpop.f32.mrb[1].mxu1  ;;  %v233_v35 = vsel %vm229_vm5, %v228_v29, 0.0  ;;  %v238_v41 = vsel %vm229_vm5, %v236_v36, 0.0  ;;  %v237_v44 = vmul.f32 %v228_v29, %v228_v29 }
 0x20f   :  { %v381_v37 = vpop.f32.mrb[2].mxu1  ;;  %234 = vadd.xlane.f32.xlu1 %v233_v35 }
 0x210   :  { %v388_v38 = vmax.f32 %v381_v37, 0.0  ;;  %v491_v39 = vpop.f32.mrb[3].mxu1  ;;  %v389_v40 = vsel %vm229_vm5, %v387_v33, 0.0  ;;  %v395_v42 = vmul.f32 %v387_v33, %v387_v33  ;;  %v241_v46 = vsel %vm229_vm5, %v237_v44, 0.0 }
 0x211   :  { %390 = vadd.xlane.f32.xlu0 %v389_v40 }
 0x212   :  { %v392_v43 = vsel %vm229_vm5, %v388_v38, 0.0  ;;  %v397_v45 = vsel %vm229_vm5, %v395_v42, 0.0  ;;  %v396_v47 = vmul.f32 %v388_v38, %v388_v38 }
 0x213   :  { %239 = vadd.xlane.f32.xlu1 %v238_v41 }
 0x214   :  { %v400_v48 = vsel %vm229_vm5, %v396_v47, 0.0 }
 0x215   :  { %393 = vadd.xlane.f32.xlu0 %v392_v43 }
 0x217   :  { %398 = vadd.xlane.f32.xlu1 %v397_v45 }
 0x219   :  { %242 = vadd.xlane.f32.xlu0 %v241_v46 }
 0x21d   :  { %401 = vadd.xlane.f32.xlu0 %v400_v48 }
 0x29a   :  { %v232_v49 = vpop.xlane.xlu0 %231 }
 0x29c   :  { %v235_v50 = vpop.xlane.xlu1 %234 }
 0x29e   :  { %v391_v51 = vpop.xlane.xlu0 %390 }
 0x29f   :  { %v403_v52 = vadd.f32 %v391_v51, %v232_v49 }
 0x2a0   :  { %v240_v53 = vpop.xlane.xlu1 %239 }
 0x2a1   :  { %408 = vst.msk [vmem:[#allocation8] sm:$0xff] %vm407_vm6, %v403_v52 }
 0x2a2   :  { %v394_v54 = vpop.xlane.xlu0 %393 }
 0x2a3   :  { %v404_v55 = vadd.f32 %v394_v54, %v235_v50 }
 0x2a4   :  { %v399_v56 = vpop.xlane.xlu1 %398 }
 0x2a5   :  { %409 = vst.msk [vmem:[#allocation8 + $0x8] sm:$0xff] %vm407_vm6, %v404_v55  ;;  %v405_v57 = vadd.f32 %v399_v56, %v240_v53 }
 0x2a6   :  { %v243_v58 = vpop.xlane.xlu0 %242 }
 0x2a7   :  { %411 = vst.msk [vmem:[#allocation8] sm:$0xff] %vm410_vm7, %v405_v57 }
 0x2aa   :  { %v402_v59 = vpop.xlane.xlu0 %401 }
 0x2ab   :  { %v406_v60 = vadd.f32 %v402_v59, %v243_v58 }
 0x2ad   :  { %412 = vst.msk [vmem:[#allocation8 + $0x8] sm:$0xff] %vm410_vm7, %v406_v60 }
 0x2ae   :  { %581 = shalt.err (!%p578_p6)
}
 0x2af   :  { %s582_s17 = scalar_lea.hbm %s698_s2, 256 }
 0x2b0   :  { %p583_p7 = scmp.ne.s32.totalorder %s698_s2, %s582_s17  ;;  %p586_p8 = scmp.lt.u32.totalorder %s582_s17, %s698_s2 }
 0x2b2   :  { %p588_p9 = pnand %p586_p8, %p583_p7 }
 0x2b4   :  { %591 = shalt.err (!%p588_p9)
}
 0x2b5   :  { %424 = dma.vmem_to_hbm [thread:$0]  %s419_s13, 256, %s698_s2, [#allocation5], %s599_s19, %s599_s19, %s600_s20  }
 0x2b6   :  { %596 = dma.done.wait [#allocation5], 256  }
 0x2b7   :  { %597 = vsyncadd [#allocation5], 4294967040 }
 0x2b8   :  { %428 = vsyncpa [#allocation4], 1 }
 0x2b9   :  { %429 = vsyncpa [#allocation7], 1 }
 0x2ba   :  { %430 = vsyncpa [#allocation5], 1 }

// kernel: run.3
= control target key start
LH: loop header
LB: loop body
LE: loop exit
PB: predicated region body
PF: predicated region fallthrough
CT: control target
= control target key end

     0   :  { %8 = vsyncpa [#allocation4], 0  ;;  %s787_s0 = inlined_call_operand.hbm [shape: f32[2,8,16], index: 0, kind: input, shape index: {}]   ;;  %s788_s1 = inlined_call_operand.hbm [shape: bf16[16,24], index: 1, kind: input, shape index: {}]   ;;  %s789_s2 = inlined_call_operand.hbm [shape: f32[16,2], index: 2, kind: input, shape index: {}]   ;;  %s790_s3 = inlined_call_operand.hbm [shape: f32[2,16,16], index: 3, kind: output, shape index: {}]  }
   0x1   :  { %9 = vsyncpa [#allocation7], 0 }
   0x2   :  { %10 = vsyncpa [#allocation5], 0  ;;  %s659_s12 = smov [#allocation6]   ;;  %s565_s16 = scalar_lea.hbm %s788_s1, 128 }
   0x3   :  { %s28_s13 = sshll.u32 %s659_s12, 4  ;;  %p566_p0 = scmp.ne.s32.totalorder %s788_s1, %s565_s16  ;;  %s29_s13 = int_to_ptr.vmem [resolvable:$true] %s28_s13 }
   0x4   :  { %p569_p1 = scmp.lt.u32.totalorder %s565_s16, %s788_s1 }
   0x6   :  { %p571_p2 = pnand %p569_p1, %p566_p0 }
   0x8   :  { %574 = shalt.err (!%p571_p2)
}
   0x9   :  { %s575_s21 = scalar_lea.vmem %s29_s13, 128  ;;  %p580_p4 = scmp.lt.s32.totalorder %s29_s13, %s29_s13 }
   0xa   :  { %p576_p3 = scmp.ne.s32.totalorder %s29_s13, %s575_s21  ;;  %p581_p5 = scmp.lt.s32.totalorder %s575_s21, %s575_s21 }
   0xc   :  { %p582_p6 = por %p581_p5, %p580_p4 }
   0xe   :  { %p583_p7 = pnand %p582_p6, %p576_p3 }
  0x10   :  { %586 = shalt.err (!%p583_p7)
}
  0x11   :  { %s660_s22 = smov 64   ;;  %s661_s23 = smov 4  }
  0x12   :  { %34 = dma.hbm_to_vmem [thread:$0]  %s788_s1, 128, %s29_s13, [#allocation7], %s660_s22, %s660_s22, %s661_s23  }
  0x13   :  { %s662_s26 = smov [#allocation3]   ;;  %s587_s30 = scalar_lea.hbm %s787_s0, 256 }
  0x14   :  { %s16_s27 = sshll.u32 %s662_s26, 4  ;;  %p588_p8 = scmp.ne.s32.totalorder %s787_s0, %s587_s30  ;;  %s17_s27 = int_to_ptr.vmem [resolvable:$true] %s16_s27 }
  0x15   :  { %p591_p9 = scmp.lt.u32.totalorder %s587_s30, %s787_s0 }
  0x17   :  { %p593_p10 = pnand %p591_p9, %p588_p8 }
  0x19   :  { %596 = shalt.err (!%p593_p10)
}
  0x1a   :  { %s597_s8 = scalar_lea.vmem %s17_s27, 256  ;;  %p602_p12 = scmp.lt.s32.totalorder %s17_s27, %s17_s27 }
  0x1b   :  { %p598_p11 = scmp.ne.s32.totalorder %s17_s27, %s597_s8  ;;  %p603_p13 = scmp.lt.s32.totalorder %s597_s8, %s597_s8 }
  0x1d   :  { %p604_p0 = por %p603_p13, %p602_p12 }
  0x1f   :  { %p605_p1 = pnand %p604_p0, %p598_p11 }
  0x21   :  { %608 = shalt.err (!%p605_p1)
}
  0x22   :  { %s663_s1 = smov 128   ;;  %s664_s9 = smov 8  }
  0x23   :  { %22 = dma.hbm_to_vmem [thread:$0]  %s787_s0, 256, %s17_s27, [#allocation4], %s663_s1, %s663_s1, %s664_s9  }
  0x24   :  { %s665_s12 = smov [#allocation8]   ;;  %s609_s16 = scalar_lea.hbm %s789_s2, 256 }
  0x25   :  { %s40_s13 = sshll.u32 %s665_s12, 4  ;;  %p610_p2 = scmp.ne.s32.totalorder %s789_s2, %s609_s16  ;;  %s41_s13 = int_to_ptr.vmem [resolvable:$true] %s40_s13 }
  0x26   :  { %p613_p3 = scmp.lt.u32.totalorder %s609_s16, %s789_s2 }
  0x28   :  { %p615_p4 = pnand %p613_p3, %p610_p2 }
  0x2a   :  { %618 = shalt.err (!%p615_p4)
}
  0x2b   :  { %s619_s21 = scalar_lea.vmem %s41_s13, 256  ;;  %p624_p6 = scmp.lt.s32.totalorder %s41_s13, %s41_s13 }
  0x2c   :  { %p620_p5 = scmp.ne.s32.totalorder %s41_s13, %s619_s21  ;;  %p625_p7 = scmp.lt.s32.totalorder %s619_s21, %s619_s21 }
  0x2e   :  { %p626_p8 = por %p625_p7, %p624_p6 }
  0x30   :  { %p627_p9 = pnand %p626_p8, %p620_p5 }
  0x32   :  { %630 = shalt.err (!%p627_p9)
}
  0x33   :  { %46 = dma.hbm_to_vmem [thread:$0]  %s789_s2, 256, %s41_s13, [#allocation7], %s663_s1, %s663_s1, %s664_s9  }
  0x34   :  { %653 = dma.done.wait [#allocation4], 256  }
  0x35   :  { %654 = vsyncadd [#allocation4], 4294967040 }
  0x36   :  { %655 = dma.done.wait [#allocation7], 384  }
  0x37   :  { %656 = vsyncadd [#allocation7], 4294966912  ;;  %vm57_vm0 = vcmask 142336   ;;  %v666_v0 = vmov 0   ;;  %v60_v1 = vld [vmem:[#allocation3] sm:$0xff]  ;;  %v61_v2 = vld [vmem:[#allocation3 + $0x8] sm:$0xff] }
  0x38   :  { %58 = vst.msk [vmem:[#allocation2] sm:$0xf] %vm57_vm0, %v666_v0  ;;  %59 = vst.msk [vmem:[#allocation2 + $0x4] sm:$0xf] %vm57_vm0, %v666_v0  ;;  %558 = vset.pattern.permute.xlu1 %v666_v0  ;;  %557 = vset.pattern.permute.xlu0 %v666_v0  ;;  %v474_v3 = vpack.c.bf16 %v60_v1, %v60_v1  ;;  %s667_s23 = smov 1   ;;  %v475_v4 = vpack.c.bf16 %v61_v2, %v61_v2  ;;  %v561_v5 = vld [vmem:[#allocation6] sm:$0xff]  }
  0x39   :  { %s668_s24 = smov 120   ;;  %vm76_vm1 = vcmask 134152   ;;  %v669_v6 = vmov 0.0   ;;  %vm670_vm2 = vmmov 0   ;;  %s671_s2 = smov 126   ;;  %v564_v13 = vld [vmem:[#allocation6] sm:$0xff]  }
  0x3a   :  { %70 = vrot.lane.b32.xlu0 %v474_v3, %s667_s23  ;;  %488 = vmatprep.subr.bf16.mxu0 %v669_v6  ;;  %s672_s25 = smov 127   ;;  %s673_s26 = smov 112   ;;  %v80_v14 = vld [vmem:[#allocation8 + $0x8] sm:$0xff]  ;;  %v79_v15 = vld [vmem:[#allocation8] sm:$0xff]  ;;  %v674_v16 = vmov 1   ;;  %vm100_vm3 = vcmask 1043456  }
  0x3b   :  { %506 = vmatprep.subr.bf16.mxu1 %v669_v6  ;;  %490 = vmatprep.mubr.msk.bf16.mxu0 %vm670_vm2, %v669_v6  ;;  %vm96_vm4 = vcmask 64512   ;;  %vm269_vm5 = vcmask 130048   ;;  %s675_s27 = smov [#allocation9]  }
  0x3c   :  { %508 = vmatprep.mubr.msk.bf16.mxu1 %vm670_vm2, %v669_v6  ;;  %s449_s28 = sshll.u32 %s675_s27, 4  ;;  %s450_s28 = int_to_ptr.vmem [resolvable:$true] %s449_s28 }
  0x3d   :  { %s631_s29 = scalar_lea.vmem %s450_s28, 512  ;;  %p636_p11 = scmp.lt.s32.totalorder %s450_s28, %s450_s28 }
  0x3e   :  { %72 = vrot.lane.b32.xlu0 %v475_v4, %s667_s23  ;;  %p632_p10 = scmp.ne.s32.totalorder %s450_s28, %s631_s29  ;;  %p637_p12 = scmp.lt.s32.totalorder %s631_s29, %s631_s29 }
  0x40   :  { %p638_p13 = por %p637_p12, %p636_p11 }
  0x42   :  { %89 = vrot.lane.b32.xlu0 %v561_v5, %s668_s24  ;;  %p639_p0 = pnand %p638_p13, %p632_p10 }
  0xac   :  { %v71_v7 = vpop.permute.xlu0 %70 }
  0xad   :  { %77 = vst.msk [vmem:[#allocation2] sm:$0xf] %vm76_vm1, %v71_v7 }
  0xb0   :  { %v73_v8 = vpop.permute.xlu0 %72 }
  0xb1   :  { %78 = vst.msk [vmem:[#allocation2 + $0x4] sm:$0xf] %vm76_vm1, %v73_v8 }
  0xb4   :  { %v83_v9 = vld [vmem:[#allocation2] sm:$0xf]  ;;  %v90_v19 = vpop.permute.xlu0 %89 }
  0xb5   :  { %v465_v10 = vcombine.low %v83_v9, %v83_v9  ;;  %v149_v21 = vsel %vm100_vm3, %v83_v9, 0 }
  0xb7   :  { %194 = vrot.lane.b32.xlu0 %v465_v10, %s671_s2  ;;  %94 = vrot.lane.b32.xlu1 %v465_v10, %s672_s25 }
  0xb8   :  { %v275_v11 = vld [vmem:[#allocation2 + $0x4] sm:$0xf] }
  0xb9   :  { %v470_v12 = vcombine.low %v275_v11, %v275_v11  ;;  %v339_v24 = vsel %vm100_vm3, %v275_v11, 0 }
  0xbb   :  { %286 = vrot.lane.b32.xlu1 %v470_v12, %s672_s25  ;;  %192 = vrot.lane.b32.xlu0 %v561_v5, %s673_s26 }
  0xbf   :  { %281 = vrot.lane.b32.xlu1 %v564_v13, %s668_s24  ;;  %249 = vperm.xlu0 %557, %v79_v15  }
  0xc3   :  { %384 = vrot.lane.b32.xlu1 %v470_v12, %s671_s2  ;;  %560 = vset.pattern.permute.xlu0 %v674_v16 }
  0xc4   :  { %264 = vperm.xlu0 %560, %v80_v14  }
  0xc7   :  { %382 = vrot.lane.b32.xlu1 %v564_v13, %s673_s26 }
  0xcb   :  { %254 = vperm.xlu1 %558, %v80_v14  }
  0xcf   :  { %559 = vset.pattern.permute.xlu1 %v674_v16 }
  0xd0   :  { %260 = vperm.xlu1 %559, %v79_v15  }
 0x129   :  { %v95_v17 = vpop.permute.xlu1 %94  ;;  %v195_v25 = vpop.permute.xlu0 %194 }
 0x12a   :  { %v102_v18 = vsel %vm100_vm3, %v95_v17, 0  ;;  %v200_v26 = vsel %vm100_vm3, %v195_v25, 0 }
 0x12b   :  { %489 = vmatpush3.bf16.msra.mxu0 %v102_v18 }
 0x12c   :  { %494 = vmatprep.subr.bf16.mxu0 %v669_v6 }
 0x12d   :  { %v287_v20 = vpop.permute.xlu1 %286  ;;  %v193_v29 = vpop.permute.xlu0 %192 }
 0x12e   :  { %491 = vmatmul.mubr.msk.bf16.vlgmr.msra.gmra.mrb[0].mxu0 %vm96_vm4, %v90_v19  ;;  %v292_v22 = vsel %vm100_vm3, %v287_v20, 0 }
 0x12f   :  { %495 = vmatpush3.bf16.msra.mxu0 %v149_v21  ;;  %507 = vmatpush3.bf16.msra.mxu1 %v292_v22 }
 0x130   :  { %512 = vmatprep.subr.bf16.mxu1 %v669_v6  ;;  %496 = vmatprep.mubr.msk.bf16.mxu0 %vm670_vm2, %v669_v6 }
 0x131   :  { %v282_v23 = vpop.permute.xlu1 %281  ;;  %500 = vmatprep.subr.bf16.mxu0 %v669_v6 }
 0x132   :  { %509 = vmatmul.mubr.msk.bf16.vlgmr.msra.gmra.mrb[0].mxu1 %vm96_vm4, %v282_v23 }
 0x133   :  { %513 = vmatpush3.bf16.msra.mxu1 %v339_v24  ;;  %514 = vmatprep.mubr.msk.bf16.mxu1 %vm670_vm2, %v669_v6 }
 0x134   :  { %518 = vmatprep.subr.bf16.mxu1 %v669_v6 }
 0x135   :  { %v385_v27 = vpop.permute.xlu1 %384 }
 0x136   :  { %v390_v28 = vsel %vm100_vm3, %v385_v27, 0 }
 0x139   :  { %v383_v30 = vpop.permute.xlu1 %382 }
 0x13a   :  { %497 = vmatmul.mubr.msk.bf16.vlgmr.msra.gmra.mrb[0].mxu0 %vm96_vm4, %v561_v5 }
 0x13b   :  { %501 = vmatpush3.bf16.msra.mxu0 %v200_v26  ;;  %502 = vmatprep.mubr.msk.bf16.mxu0 %vm670_vm2, %v669_v6 }
 0x13e   :  { %515 = vmatmul.mubr.msk.bf16.vlgmr.msra.gmra.mrb[0].mxu1 %vm96_vm4, %v564_v13  ;;  %v250_v32 = vpop.permute.xlu0 %249 }
 0x13f   :  { %519 = vmatpush3.bf16.msra.mxu1 %v390_v28  ;;  %520 = vmatprep.mubr.msk.bf16.mxu1 %vm670_vm2, %v669_v6 }
 0x143   :  { %v265_v42 = vpop.permute.xlu0 %264 }
 0x146   :  { %503 = vmatmul.mubr.msk.bf16.vlgmr.msra.gmra.mrb[0].mxu0 %vm96_vm4, %v193_v29 }
 0x14a   :  { %521 = vmatmul.mubr.msk.bf16.vlgmr.msra.gmra.mrb[0].mxu1 %vm96_vm4, %v383_v30  ;;  %v255_v31 = vpop.permute.xlu1 %254 }
 0x14f   :  { %v261_v37 = vpop.permute.xlu1 %260 }
 0x219   :  { %v236_v33 = vpop.f32.mrb[0].mxu0 }
 0x21a   :  { %v245_v34 = vmax.f32 %v236_v33, 0.0  ;;  %v504_v35 = vpop.f32.mrb[1].mxu0 }
 0x21b   :  { %v239_v36 = vpop.f32.mrb[2].mxu0 }
 0x21c   :  { %v257_v38 = vmul.f32 %v250_v32, %v245_v34  ;;  %v246_v39 = vmax.f32 %v239_v36, 0.0  ;;  %v505_v40 = vpop.f32.mrb[3].mxu0 }
 0x21d   :  { %v426_v41 = vpop.f32.mrb[0].mxu1 }
 0x21e   :  { %v435_v43 = vmax.f32 %v426_v41, 0.0  ;;  %v267_v44 = vadd.f32 %v261_v37, %v257_v38  ;;  %v522_v45 = vpop.f32.mrb[1].mxu1  ;;  %v258_v46 = vmul.f32 %v255_v31, %v246_v39 }
 0x21f   :  { %v429_v47 = vpop.f32.mrb[2].mxu1 }
 0x220   :  { %v437_v48 = vmul.f32 %v435_v43, %v250_v32  ;;  %270 = vst.msk [vmem:[#allocation9] sm:$0xff] %vm269_vm5, %v267_v44  ;;  %v268_v49 = vadd.f32 %v265_v42, %v258_v46  ;;  %v436_v50 = vmax.f32 %v429_v47, 0.0  ;;  %v523_v51 = vpop.f32.mrb[3].mxu1 }
 0x222   :  { %v439_v52 = vadd.f32 %v437_v48, %v261_v37  ;;  %271 = vst.msk [vmem:[#allocation9 + $0x8] sm:$0xff] %vm269_vm5, %v268_v49  ;;  %v438_v53 = vmul.f32 %v436_v50, %v255_v31 }
 0x224   :  { %442 = vst.msk [vmem:[#allocation9 + $0x10] sm:$0xff] %vm269_vm5, %v439_v52  ;;  %v440_v54 = vadd.f32 %v438_v53, %v265_v42 }
 0x226   :  { %443 = vst.msk [vmem:[#allocation9 + $0x18] sm:$0xff] %vm269_vm5, %v440_v54 }
 0x227   :  { %642 = shalt.err (!%p639_p0)
}
 0x228   :  { %s643_s5 = scalar_lea.hbm %s790_s3, 512 }
 0x229   :  { %p644_p1 = scmp.ne.s32.totalorder %s790_s3, %s643_s5  ;;  %p647_p2 = scmp.lt.u32.totalorder %s643_s5, %s790_s3 }
 0x22b   :  { %p649_p3 = pnand %p647_p2, %p644_p1 }
 0x22d   :  { %652 = shalt.err (!%p649_p3)
}
 0x22e   :  { %455 = dma.vmem_to_hbm [thread:$0]  %s450_s28, 512, %s790_s3, [#allocation5], %s663_s1, %s663_s1, %s664_s9  }
 0x22f   :  { %657 = dma.done.wait [#allocation5], 512  }
 0x230   :  { %658 = vsyncadd [#allocation5], 4294966784 }
 0x231   :  { %459 = vsyncpa [#allocation4], 1 }
 0x232   :  { %460 = vsyncpa [#allocation7], 1 }
 0x233   :  { %461 = vsyncpa [#allocation5], 1 }

</bundles_post_ra>
